<compile_context>
chip_gen: v7x
topology: tpu7x:2x2x1
jax: 0.10.0
libtpu: 0.0.40
codegen_flags: <defaults>
</compile_context>

<pallas_src>
import math

import jax
import jax.numpy as jnp
from jax.experimental import pallas as pl
from jax.experimental.pallas import tpu as pltpu

# ---- model config (small, deterministic) -----------------------------------
D_MODEL = 32
N_HEAD = 4
HEAD_DIM = D_MODEL // N_HEAD
DIM_FF = 64
SEQ = 8
BATCH = 2
LN_EPS = 1e-5
ATTN_SCALE = 1.0 / math.sqrt(HEAD_DIM)

ROWS = SEQ * BATCH          # 16 token rows, row index r = s * BATCH + b
HROWS = N_HEAD * ROWS       # 64 head-stacked rows, row index i = h * ROWS + r
PACK_W = 3 * D_MODEL        # lane width of the weight/vector packs (96)

# Row offsets of each matrix inside the (160, 96) weight pack (all multiples of 8).
_WIN_R0 = 0                 # W_in^T  (32, 96)
_WOUT_R0 = D_MODEL          # W_out^T (32, 32)
_W1_R0 = 2 * D_MODEL        # W_1^T   (32, 64)
_W2_R0 = 3 * D_MODEL        # W_2^T   (64, 32)

# Bit trick for the attention block mask: head-stacked row index
#   i = h*ROWS + s*BATCH + b  ->  bit 0 = b, bits [1:4) = s, bits [4:6) = h.
# Two rows attend to each other iff same head AND same batch, i.e. the h-bits and b-bits
# match:  ((i ^ j) & _SAME_GROUP_BITS) == 0.   Requires power-of-two SEQ/BATCH/N_HEAD.
assert all(v & (v - 1) == 0 for v in (SEQ, BATCH, N_HEAD))
_SAME_GROUP_BITS = (N_HEAD - 1) * ROWS + (BATCH - 1)   # = 0b110001 = 49


# ---- math helpers (shared by kernel and pure-JAX reference) ------------------
def _gelu(x):
    # tanh-approx GELU (EUP tanh); ~3e-4 max abs deviation from exact erf F.gelu.
    c = 0.7978845608028654  # sqrt(2/pi)
    return 0.5 * x * (1.0 + jnp.tanh(c * (x + 0.044715 * x * x * x)))


def _layernorm(z, g, b):
    # PyTorch LayerNorm semantics: biased variance, eps=1e-5, affine.
    mean = jnp.mean(z, axis=-1, keepdims=True)
    zc = z - mean
    var = jnp.mean(zc * zc, axis=-1, keepdims=True)
    return zc * jax.lax.rsqrt(var + LN_EPS) * g + b


def _mm(a, w):
    # plain (M,K)@(K,N) — weights are stored pre-transposed ("compute ready").
    return jnp.dot(a, w, preferred_element_type=jnp.float32)


# ---- fused Pallas kernel (single invocation, no grid) -------------------------
def encoder_layer_kernel(x_ref, wm_ref, vp_ref, o_ref):
    x = x_ref[...]                                               # (16, 32) f32

    # ---- QKV projection: one (16,32)@(32,96) MXU push ---------------------------
    # (1/sqrt(head_dim) already folded into the q columns of W_in^T / b_in.)
    qkv = _mm(x, wm_ref[_WIN_R0:_WIN_R0 + D_MODEL, :]) + vp_ref[0:1, :]   # (16, 96)

    # ---- head-batched attention --------------------------------------------------
    # Stack the H heads along sublanes: row i = h*ROWS + r, lanes = head_dim.
    def stack_heads(col0):
        return jnp.concatenate(
            [qkv[:, col0 + h * HEAD_DIM: col0 + (h + 1) * HEAD_DIM] for h in range(N_HEAD)],
            axis=0)                                              # (64, 8)

    qs = stack_heads(0)
    ks = stack_heads(D_MODEL)
    vs = stack_heads(2 * D_MODEL)

    # One (64,8)x(64,8)^T score matmul instead of B*H = 8 tiny ones.
    s = jax.lax.dot_general(qs, ks, (((1,), (1,)), ((), ())),
                            preferred_element_type=jnp.float32)  # (64, 64)

    # Block mask: keep (i, j) only if same head AND same batch (VPU-only, no div/mod).
    ri = jax.lax.broadcasted_iota(jnp.int32, (HROWS, HROWS), 0)
    ci = jax.lax.broadcasted_iota(jnp.int32, (HROWS, HROWS), 1)
    valid = ((ri ^ ci) & _SAME_GROUP_BITS) == 0
    s = jnp.where(valid, s, -1e30)

    # Row softmax (exact divide for parity; masked entries underflow to exactly 0).
    m = jnp.max(s, axis=-1, keepdims=True)
    e = jnp.exp(s - m)
    p = e / jnp.sum(e, axis=-1, keepdims=True)

    # One (64,64)@(64,8) P@V matmul for all batches/heads.
    o = _mm(p, vs)                                               # (64, 8)

    # Re-concatenate heads back to (16, 32) and apply the output projection once.
    attn = jnp.concatenate([o[h * ROWS:(h + 1) * ROWS, :] for h in range(N_HEAD)], axis=1)
    attn = _mm(attn, wm_ref[_WOUT_R0:_WOUT_R0 + D_MODEL, 0:D_MODEL]) + vp_ref[1:2, 0:D_MODEL]

    # ---- residual + LayerNorm 1 --------------------------------------------------
    x1 = _layernorm(x + attn, vp_ref[4:5, 0:D_MODEL], vp_ref[5:6, 0:D_MODEL])

    # ---- feed-forward: linear1 -> GELU -> linear2 --------------------------------
    hdn = _gelu(_mm(x1, wm_ref[_W1_R0:_W1_R0 + D_MODEL, 0:DIM_FF]) + vp_ref[2:3, 0:DIM_FF])
    y = _mm(hdn, wm_ref[_W2_R0:_W2_R0 + DIM_FF, 0:D_MODEL]) + vp_ref[3:4, 0:D_MODEL]

    # ---- residual + LayerNorm 2 --------------------------------------------------
    o_ref[...] = _layernorm(x1 + y, vp_ref[6:7, 0:D_MODEL],
                            vp_ref[7:8, 0:D_MODEL]).astype(o_ref.dtype)


# ---- wrapper: operand packing + pallas_call -----------------------------------
def _pack_params(params):
    # Fold the attention scale into the q part of the input projection (free, wrapper-side).
    scale_vec = jnp.concatenate([jnp.full((D_MODEL,), ATTN_SCALE, jnp.float32),
                                 jnp.ones((2 * D_MODEL,), jnp.float32)])
    win_t = params["in_proj_w"].T * scale_vec[None, :]           # (32, 96)
    bin_ = params["in_proj_b"] * scale_vec                       # (96,)
    wout_t = params["out_proj_w"].T                              # (32, 32)
    w1_t = params["w1"].T                                        # (32, 64)
    w2_t = params["w2"].T                                        # (64, 32)

    def padw(w):   # pad lane dim to PACK_W
        return jnp.pad(w, ((0, 0), (0, PACK_W - w.shape[1])))

    wmat = jnp.concatenate([padw(win_t), padw(wout_t), padw(w1_t), padw(w2_t)],
                           axis=0).astype(jnp.float32)           # (160, 96)

    def padv(v):
        return jnp.pad(v, (0, PACK_W - v.shape[0]))[None, :]

    vecs = jnp.concatenate(
        [padv(bin_), padv(params["out_proj_b"]), padv(params["b1"]), padv(params["b2"]),
         padv(params["ln1_g"]), padv(params["ln1_b"]),
         padv(params["ln2_g"]), padv(params["ln2_b"])],
        axis=0).astype(jnp.float32)                              # (8, 96)
    return wmat, vecs


def transformer_encoder_layer(src, params):
    S, B, D = src.shape
    assert (S, B, D) == (SEQ, BATCH, D_MODEL)
    wmat, vecs = _pack_params(params)
    x2d = src.reshape(S * B, D)        # row r = s*B + b (plain contiguous reshape)

    vmem = lambda: pl.BlockSpec(memory_space=pltpu.MemorySpace.VMEM)
    out = pl.pallas_call(
        encoder_layer_kernel,
        out_shape=jax.ShapeDtypeStruct((S * B, D), src.dtype),
        in_specs=[vmem(), vmem(), vmem()],
        out_specs=vmem(),
    )(x2d, wmat, vecs)
    return out.reshape(S, B, D)


# ---- pure-JAX reference (mirrors the PyTorch module, eval mode) ----------------
def _reference(src, p):
    S, B, D = src.shape
    qkv = jnp.einsum("sbd,ed->sbe", src, p["in_proj_w"]) + p["in_proj_b"]
    q, k, v = qkv[..., :D], qkv[..., D:2 * D], qkv[..., 2 * D:]
    q = q * ATTN_SCALE
    qh = q.reshape(S, B, N_HEAD, HEAD_DIM)
    kh = k.reshape(S, B, N_HEAD, HEAD_DIM)
    vh = v.reshape(S, B, N_HEAD, HEAD_DIM)
    att = jax.nn.softmax(jnp.einsum("sbhd,tbhd->bhst", qh, kh), axis=-1)
    oh = jnp.einsum("bhst,tbhd->sbhd", att, vh).reshape(S, B, D)
    attn = jnp.einsum("sbd,ed->sbe", oh, p["out_proj_w"]) + p["out_proj_b"]
    x1 = _layernorm(src + attn, p["ln1_g"], p["ln1_b"])
    hdn = _gelu(jnp.einsum("sbd,fd->sbf", x1, p["w1"]) + p["b1"])
    y = jnp.einsum("sbf,df->sbd", hdn, p["w2"]) + p["b2"]
    return _layernorm(x1 + y, p["ln2_g"], p["ln2_b"])


# ---- deterministic parameter init ---------------------------------------------
def init_params(key):
    ks = jax.random.split(key, 6)
    f = lambda k, shape: jax.random.normal(k, shape, jnp.float32) * 0.02
    return {
        "in_proj_w": f(ks[0], (3 * D_MODEL, D_MODEL)),
        "in_proj_b": jnp.zeros((3 * D_MODEL,), jnp.float32),
        "out_proj_w": f(ks[1], (D_MODEL, D_MODEL)),
        "out_proj_b": jnp.zeros((D_MODEL,), jnp.float32),
        "w1": f(ks[2], (DIM_FF, D_MODEL)),
        "b1": f(ks[3], (DIM_FF,)),
        "w2": f(ks[4], (D_MODEL, DIM_FF)),
        "b2": f(ks[5], (D_MODEL,)),
        "ln1_g": jnp.ones((D_MODEL,), jnp.float32),
        "ln1_b": jnp.zeros((D_MODEL,), jnp.float32),
        "ln2_g": jnp.ones((D_MODEL,), jnp.float32),
        "ln2_b": jnp.zeros((D_MODEL,), jnp.float32),
    }


if __name__ == "__main__":
    key = jax.random.PRNGKey(0)
    pkey, xkey = jax.random.split(key)
    params = init_params(pkey)
    src = jax.random.normal(xkey, (SEQ, BATCH, D_MODEL), jnp.float32)

    out = jax.jit(transformer_encoder_layer)(src, params)
    out = jax.block_until_ready(out)
    assert out.shape == (SEQ, BATCH, D_MODEL)
    assert bool(jnp.all(jnp.isfinite(out)))

    ref = _reference(src, params)
    max_err = float(jnp.max(jnp.abs(out - ref)))
    assert max_err < 1e-3, f"kernel/reference mismatch: max_err={max_err}"
    print("KERNEL_OK")
</pallas_src>

<mosaic_0001>
module attributes {stable_mosaic.version = 11 : i64} {
  func.func @encoder_layer_kernel(%arg0: memref<16x32xf32, #tpu.memory_space<vmem>>, %arg1: memref<160x96xf32, #tpu.memory_space<vmem>>, %arg2: memref<8x96xf32, #tpu.memory_space<vmem>>, %arg3: memref<16x32xf32, #tpu.memory_space<vmem>>) attributes {dimension_semantics = [], scalar_prefetch = 0 : i64, scratch_operands = 0 : i64, tpu.core_type = #tpu.core_type<tc>} {
    %c0 = arith.constant 0 : index
    %c0_0 = arith.constant 0 : index
    %0 = vector.load %arg0[%c0, %c0_0] : memref<16x32xf32, #tpu.memory_space<vmem>>, vector<16x32xf32>
    %c0_1 = arith.constant 0 : index
    %c0_2 = arith.constant 0 : index
    %1 = vector.load %arg1[%c0_1, %c0_2] : memref<160x96xf32, #tpu.memory_space<vmem>>, vector<32x96xf32>
    %cst = arith.constant dense<0.000000e+00> : vector<16x96xf32>
    %2 = tpu.matmul %0, %1, %cst {dimension_numbers = #tpu.dot_dimension_numbers<[1], [0], [0], [1], [0, 0, 1, 1], [], []>} : vector<16x32xf32>, vector<32x96xf32>, vector<16x96xf32> -> vector<16x96xf32>
    %c0_3 = arith.constant 0 : index
    %c0_4 = arith.constant 0 : index
    %3 = vector.load %arg2[%c0_3, %c0_4] : memref<8x96xf32, #tpu.memory_space<vmem>>, vector<1x96xf32>
    %4 = vector.broadcast %3 : vector<1x96xf32> to vector<16x96xf32>
    %5 = arith.addf %2, %4 : vector<16x96xf32>
    %6 = vector.extract_strided_slice %5 {offsets = [0, 0], sizes = [16, 8], strides = [1, 1]} : vector<16x96xf32> to vector<16x8xf32>
    %7 = vector.extract_strided_slice %5 {offsets = [0, 8], sizes = [16, 8], strides = [1, 1]} : vector<16x96xf32> to vector<16x8xf32>
    %8 = vector.extract_strided_slice %5 {offsets = [0, 16], sizes = [16, 8], strides = [1, 1]} : vector<16x96xf32> to vector<16x8xf32>
    %9 = vector.extract_strided_slice %5 {offsets = [0, 24], sizes = [16, 8], strides = [1, 1]} : vector<16x96xf32> to vector<16x8xf32>
    %10 = tpu.concatenate %6, %7, %8, %9 in 0 : vector<16x8xf32>, vector<16x8xf32>, vector<16x8xf32>, vector<16x8xf32> -> vector<64x8xf32>
    %11 = vector.extract_strided_slice %5 {offsets = [0, 32], sizes = [16, 8], strides = [1, 1]} : vector<16x96xf32> to vector<16x8xf32>
    %12 = vector.extract_strided_slice %5 {offsets = [0, 40], sizes = [16, 8], strides = [1, 1]} : vector<16x96xf32> to vector<16x8xf32>
    %13 = vector.extract_strided_slice %5 {offsets = [0, 48], sizes = [16, 8], strides = [1, 1]} : vector<16x96xf32> to vector<16x8xf32>
    %14 = vector.extract_strided_slice %5 {offsets = [0, 56], sizes = [16, 8], strides = [1, 1]} : vector<16x96xf32> to vector<16x8xf32>
    %15 = tpu.concatenate %11, %12, %13, %14 in 0 : vector<16x8xf32>, vector<16x8xf32>, vector<16x8xf32>, vector<16x8xf32> -> vector<64x8xf32>
    %16 = vector.extract_strided_slice %5 {offsets = [0, 64], sizes = [16, 8], strides = [1, 1]} : vector<16x96xf32> to vector<16x8xf32>
    %17 = vector.extract_strided_slice %5 {offsets = [0, 72], sizes = [16, 8], strides = [1, 1]} : vector<16x96xf32> to vector<16x8xf32>
    %18 = vector.extract_strided_slice %5 {offsets = [0, 80], sizes = [16, 8], strides = [1, 1]} : vector<16x96xf32> to vector<16x8xf32>
    %19 = vector.extract_strided_slice %5 {offsets = [0, 88], sizes = [16, 8], strides = [1, 1]} : vector<16x96xf32> to vector<16x8xf32>
    %20 = tpu.concatenate %16, %17, %18, %19 in 0 : vector<16x8xf32>, vector<16x8xf32>, vector<16x8xf32>, vector<16x8xf32> -> vector<64x8xf32>
    %cst_5 = arith.constant dense<0.000000e+00> : vector<64x64xf32>
    %21 = tpu.matmul %10, %15, %cst_5 {dimension_numbers = #tpu.dot_dimension_numbers<[1], [1], [0], [0], [0, 0, 1, 0], [], []>} : vector<64x8xf32>, vector<64x8xf32>, vector<64x64xf32> -> vector<64x64xf32>
    %22 = tpu.iota {dimensions = array<i32: 0>} : vector<64x64xi32>
    %23 = tpu.iota {dimensions = array<i32: 1>} : vector<64x64xi32>
    %24 = arith.xori %22, %23 : vector<64x64xi32>
    %c49_i32 = arith.constant 49 : i32
    %25 = vector.broadcast %c49_i32 : i32 to vector<64x64xi32>
    %26 = arith.andi %24, %25 : vector<64x64xi32>
    %c0_i32 = arith.constant 0 : i32
    %27 = vector.broadcast %c0_i32 : i32 to vector<64x64xi32>
    %28 = arith.cmpi eq, %26, %27 : vector<64x64xi32>
    %cst_6 = arith.constant -1.000000e+30 : f32
    %29 = vector.broadcast %cst_6 : f32 to vector<64x64xf32>
    %30 = arith.select %28, %21, %29 : vector<64x64xi1>, vector<64x64xf32>
    %cst_7 = arith.constant dense<0xFF800000> : vector<64xf32>
    %31 = vector.multi_reduction <maximumf>, %30, %cst_7 [1] : vector<64x64xf32> to vector<64xf32>
    %32 = vector.shape_cast %31 : vector<64xf32> to vector<64x1xf32>
    %33 = vector.broadcast %32 : vector<64x1xf32> to vector<64x64xf32>
    %34 = arith.subf %30, %33 : vector<64x64xf32>
    %35 = math.exp %34 : vector<64x64xf32>
    %cst_8 = arith.constant dense<0.000000e+00> : vector<64xf32>
    %36 = vector.multi_reduction <add>, %35, %cst_8 [1] : vector<64x64xf32> to vector<64xf32>
    %37 = vector.shape_cast %36 : vector<64xf32> to vector<64x1xf32>
    %38 = vector.broadcast %37 : vector<64x1xf32> to vector<64x64xf32>
    %39 = arith.divf %35, %38 : vector<64x64xf32>
    %cst_9 = arith.constant dense<0.000000e+00> : vector<64x8xf32>
    %40 = tpu.matmul %39, %20, %cst_9 {dimension_numbers = #tpu.dot_dimension_numbers<[1], [0], [0], [1], [0, 0, 1, 1], [], []>} : vector<64x64xf32>, vector<64x8xf32>, vector<64x8xf32> -> vector<64x8xf32>
    %41 = vector.extract_strided_slice %40 {offsets = [0, 0], sizes = [16, 8], strides = [1, 1]} : vector<64x8xf32> to vector<16x8xf32>
    %42 = vector.extract_strided_slice %40 {offsets = [16, 0], sizes = [16, 8], strides = [1, 1]} : vector<64x8xf32> to vector<16x8xf32>
    %43 = vector.extract_strided_slice %40 {offsets = [32, 0], sizes = [16, 8], strides = [1, 1]} : vector<64x8xf32> to vector<16x8xf32>
    %44 = vector.extract_strided_slice %40 {offsets = [48, 0], sizes = [16, 8], strides = [1, 1]} : vector<64x8xf32> to vector<16x8xf32>
    %45 = tpu.concatenate %41, %42, %43, %44 in 1 : vector<16x8xf32>, vector<16x8xf32>, vector<16x8xf32>, vector<16x8xf32> -> vector<16x32xf32>
    %c32 = arith.constant 32 : index
    %c0_10 = arith.constant 0 : index
    %46 = vector.load %arg1[%c32, %c0_10] : memref<160x96xf32, #tpu.memory_space<vmem>>, vector<32x32xf32>
    %cst_11 = arith.constant dense<0.000000e+00> : vector<16x32xf32>
    %47 = tpu.matmul %45, %46, %cst_11 {dimension_numbers = #tpu.dot_dimension_numbers<[1], [0], [0], [1], [0, 0, 1, 1], [], []>} : vector<16x32xf32>, vector<32x32xf32>, vector<16x32xf32> -> vector<16x32xf32>
    %c1 = arith.constant 1 : index
    %c0_12 = arith.constant 0 : index
    %48 = vector.load %arg2[%c1, %c0_12] : memref<8x96xf32, #tpu.memory_space<vmem>>, vector<1x32xf32>
    %49 = vector.broadcast %48 : vector<1x32xf32> to vector<16x32xf32>
    %50 = arith.addf %47, %49 : vector<16x32xf32>
    %51 = arith.addf %0, %50 : vector<16x32xf32>
    %c4 = arith.constant 4 : index
    %c0_13 = arith.constant 0 : index
    %52 = vector.load %arg2[%c4, %c0_13] : memref<8x96xf32, #tpu.memory_space<vmem>>, vector<1x32xf32>
    %c5 = arith.constant 5 : index
    %c0_14 = arith.constant 0 : index
    %53 = vector.load %arg2[%c5, %c0_14] : memref<8x96xf32, #tpu.memory_space<vmem>>, vector<1x32xf32>
    %cst_15 = arith.constant dense<0.000000e+00> : vector<16xf32>
    %54 = vector.multi_reduction <add>, %51, %cst_15 [1] : vector<16x32xf32> to vector<16xf32>
    %55 = vector.shape_cast %54 : vector<16xf32> to vector<16x1xf32>
    %cst_16 = arith.constant 3.200000e+01 : f32
    %56 = vector.broadcast %cst_16 : f32 to vector<16x1xf32>
    %57 = arith.divf %55, %56 : vector<16x1xf32>
    %58 = vector.broadcast %57 : vector<16x1xf32> to vector<16x32xf32>
    %59 = arith.subf %51, %58 : vector<16x32xf32>
    %60 = arith.mulf %59, %59 : vector<16x32xf32>
    %cst_17 = arith.constant dense<0.000000e+00> : vector<16xf32>
    %61 = vector.multi_reduction <add>, %60, %cst_17 [1] : vector<16x32xf32> to vector<16xf32>
    %62 = vector.shape_cast %61 : vector<16xf32> to vector<16x1xf32>
    %cst_18 = arith.constant 3.200000e+01 : f32
    %63 = vector.broadcast %cst_18 : f32 to vector<16x1xf32>
    %64 = arith.divf %62, %63 : vector<16x1xf32>
    %cst_19 = arith.constant 9.99999974E-6 : f32
    %65 = vector.broadcast %cst_19 : f32 to vector<16x1xf32>
    %66 = arith.addf %64, %65 : vector<16x1xf32>
    %67 = math.rsqrt %66 : vector<16x1xf32>
    %68 = vector.broadcast %67 : vector<16x1xf32> to vector<16x32xf32>
    %69 = arith.mulf %59, %68 : vector<16x32xf32>
    %70 = vector.broadcast %52 : vector<1x32xf32> to vector<16x32xf32>
    %71 = arith.mulf %69, %70 : vector<16x32xf32>
    %72 = vector.broadcast %53 : vector<1x32xf32> to vector<16x32xf32>
    %73 = arith.addf %71, %72 : vector<16x32xf32>
    %c64 = arith.constant 64 : index
    %c0_20 = arith.constant 0 : index
    %74 = vector.load %arg1[%c64, %c0_20] : memref<160x96xf32, #tpu.memory_space<vmem>>, vector<32x64xf32>
    %cst_21 = arith.constant dense<0.000000e+00> : vector<16x64xf32>
    %75 = tpu.matmul %73, %74, %cst_21 {dimension_numbers = #tpu.dot_dimension_numbers<[1], [0], [0], [1], [0, 0, 1, 1], [], []>} : vector<16x32xf32>, vector<32x64xf32>, vector<16x64xf32> -> vector<16x64xf32>
    %c2 = arith.constant 2 : index
    %c0_22 = arith.constant 0 : index
    %76 = vector.load %arg2[%c2, %c0_22] : memref<8x96xf32, #tpu.memory_space<vmem>>, vector<1x64xf32>
    %77 = vector.broadcast %76 : vector<1x64xf32> to vector<16x64xf32>
    %78 = arith.addf %75, %77 : vector<16x64xf32>
    %cst_23 = arith.constant 5.000000e-01 : f32
    %79 = vector.broadcast %cst_23 : f32 to vector<16x64xf32>
    %80 = arith.mulf %79, %78 : vector<16x64xf32>
    %cst_24 = arith.constant 4.471500e-02 : f32
    %81 = vector.broadcast %cst_24 : f32 to vector<16x64xf32>
    %82 = arith.mulf %81, %78 : vector<16x64xf32>
    %83 = arith.mulf %82, %78 : vector<16x64xf32>
    %84 = arith.mulf %83, %78 : vector<16x64xf32>
    %85 = arith.addf %78, %84 : vector<16x64xf32>
    %cst_25 = arith.constant 0.797884583 : f32
    %86 = vector.broadcast %cst_25 : f32 to vector<16x64xf32>
    %87 = arith.mulf %86, %85 : vector<16x64xf32>
    %88 = math.tanh %87 : vector<16x64xf32>
    %cst_26 = arith.constant 1.000000e+00 : f32
    %89 = vector.broadcast %cst_26 : f32 to vector<16x64xf32>
    %90 = arith.addf %89, %88 : vector<16x64xf32>
    %91 = arith.mulf %80, %90 : vector<16x64xf32>
    %c96 = arith.constant 96 : index
    %c0_27 = arith.constant 0 : index
    %92 = vector.load %arg1[%c96, %c0_27] : memref<160x96xf32, #tpu.memory_space<vmem>>, vector<64x32xf32>
    %cst_28 = arith.constant dense<0.000000e+00> : vector<16x32xf32>
    %93 = tpu.matmul %91, %92, %cst_28 {dimension_numbers = #tpu.dot_dimension_numbers<[1], [0], [0], [1], [0, 0, 1, 1], [], []>} : vector<16x64xf32>, vector<64x32xf32>, vector<16x32xf32> -> vector<16x32xf32>
    %c3 = arith.constant 3 : index
    %c0_29 = arith.constant 0 : index
    %94 = vector.load %arg2[%c3, %c0_29] : memref<8x96xf32, #tpu.memory_space<vmem>>, vector<1x32xf32>
    %95 = vector.broadcast %94 : vector<1x32xf32> to vector<16x32xf32>
    %96 = arith.addf %93, %95 : vector<16x32xf32>
    %97 = arith.addf %73, %96 : vector<16x32xf32>
    %c6 = arith.constant 6 : index
    %c0_30 = arith.constant 0 : index
    %98 = vector.load %arg2[%c6, %c0_30] : memref<8x96xf32, #tpu.memory_space<vmem>>, vector<1x32xf32>
    %c7 = arith.constant 7 : index
    %c0_31 = arith.constant 0 : index
    %99 = vector.load %arg2[%c7, %c0_31] : memref<8x96xf32, #tpu.memory_space<vmem>>, vector<1x32xf32>
    %cst_32 = arith.constant dense<0.000000e+00> : vector<16xf32>
    %100 = vector.multi_reduction <add>, %97, %cst_32 [1] : vector<16x32xf32> to vector<16xf32>
    %101 = vector.shape_cast %100 : vector<16xf32> to vector<16x1xf32>
    %cst_33 = arith.constant 3.200000e+01 : f32
    %102 = vector.broadcast %cst_33 : f32 to vector<16x1xf32>
    %103 = arith.divf %101, %102 : vector<16x1xf32>
    %104 = vector.broadcast %103 : vector<16x1xf32> to vector<16x32xf32>
    %105 = arith.subf %97, %104 : vector<16x32xf32>
    %106 = arith.mulf %105, %105 : vector<16x32xf32>
    %cst_34 = arith.constant dense<0.000000e+00> : vector<16xf32>
    %107 = vector.multi_reduction <add>, %106, %cst_34 [1] : vector<16x32xf32> to vector<16xf32>
    %108 = vector.shape_cast %107 : vector<16xf32> to vector<16x1xf32>
    %cst_35 = arith.constant 3.200000e+01 : f32
    %109 = vector.broadcast %cst_35 : f32 to vector<16x1xf32>
    %110 = arith.divf %108, %109 : vector<16x1xf32>
    %cst_36 = arith.constant 9.99999974E-6 : f32
    %111 = vector.broadcast %cst_36 : f32 to vector<16x1xf32>
    %112 = arith.addf %110, %111 : vector<16x1xf32>
    %113 = math.rsqrt %112 : vector<16x1xf32>
    %114 = vector.broadcast %113 : vector<16x1xf32> to vector<16x32xf32>
    %115 = arith.mulf %105, %114 : vector<16x32xf32>
    %116 = vector.broadcast %98 : vector<1x32xf32> to vector<16x32xf32>
    %117 = arith.mulf %115, %116 : vector<16x32xf32>
    %118 = vector.broadcast %99 : vector<1x32xf32> to vector<16x32xf32>
    %119 = arith.addf %117, %118 : vector<16x32xf32>
    %c0_37 = arith.constant 0 : index
    %c0_38 = arith.constant 0 : index
    %120 = vector.load %arg3[%c0_37, %c0_38] : memref<16x32xf32, #tpu.memory_space<vmem>>, vector<16x32xf32>
    tpu.vector_store %arg3[%c0_37, %c0_38], %119 {strides = array<i32>} : memref<16x32xf32, #tpu.memory_space<vmem>>, vector<16x32xf32>,
    return
  }
}

</mosaic_0001>

<bundles_post_ra>
// kernel: transformer_encoder_layer.1
= control target key start
LH: loop header
LB: loop body
LE: loop exit
PB: predicated region body
PF: predicated region fallthrough
CT: control target
= control target key end

     0   :  { %vm26_vm0 = vcmask 261120   ;;  %s1655_s0 = inlined_call_operand.vmem [shape: f32[16,32], index: 0, kind: input, shape index: {}]   ;;  %s1656_s1 = inlined_call_operand.vmem [shape: f32[160,96], index: 1, kind: input, shape index: {}]   ;;  %s1657_s2 = inlined_call_operand.vmem [shape: f32[8,96], index: 2, kind: input, shape index: {}]   ;;  %s1658_s3 = inlined_call_operand.hbm [shape: f32[16,32], index: 3, kind: output, shape index: {}]  }
   0x1   :  { %v17_v0 = vld [vmem:[%s1656_s1] sm:$0xff]  ;;  %v18_v1 = vld [vmem:[%s1656_s1 + $0x8] sm:$0xff]  ;;  %v19_v2 = vld [vmem:[%s1656_s1 + $0x10] sm:$0xff] }
   0x2   :  { %v1196_v3 = vpack.c.bf16 %v18_v1, %v17_v0  ;;  %v20_v4 = vld [vmem:[%s1656_s1 + $0x18] sm:$0xff]  ;;  %v1439_v5 = vld [vmem:[%s1655_s0] sm:$0xff] }
   0x3   :  { %v1200_v6 = vpack.c.bf16 %v20_v4, %v19_v2  ;;  %1096 = vmatprep.mubr.msk.f32.mxu0 %vm26_vm0, %v1439_v5 }
   0x4   :  { %8 = vsyncpa [#allocation3], 0  ;;  %1197 = vmatprep.subr.bf16.mxu0 %v1196_v3  ;;  %v1446_v7 = vld [vmem:[%s1655_s0 + $0x8] sm:$0xff]  ;;  %v988_v8 = vld [vmem:[%s1657_s2] ss:$0 sm:$0xff]  ;;  %vm138_vm1 = vcmask 64512   ;;  %v276_v40 = vlaneseq }
   0x5   :  { %1199 = vmatpush3.bf16.msra.mxu0 %v1196_v3  ;;  %s1394_s26 = smov 112   ;;  %s1395_s27 = smov 120   ;;  %vm1468_vm2 = vmpackc.low %vm138_vm1, %vm138_vm1  ;;  %vm319_vm5 = vcmask 523264   ;;  %vm587_vm12 = vcmask 130048   ;;  %vm590_vm13 = vcmask 195584  }
   0x6   :  { %1201 = vmatprep.subr.bf16.mxu0 %v1200_v6  ;;  %s1396_s0 = smov 104   ;;  %s1397_s28 = smov 96   ;;  %v277_v41 = vshrl.u32 %v276_v40, 7  ;;  %v286_v43 = vand.u32 127, %v276_v40 }
   0x7   :  { %s1398_s29 = smov 64   ;;  %s1399_s11 = smov 8  }
   0x8   :  { %v278_v42 = vadd.s32 8, %v277_v41  ;;  %v287_v45 = vxor.u32 %v286_v43, %v277_v41  ;;  %v279_v46 = vadd.s32 16, %v277_v41  ;;  %v280_v47 = vadd.s32 24, %v277_v41  ;;  %s1400_s12 = smov 16   ;;  %s1401_s13 = smov 24  }
   0x9   :  { %1203 = vmatpush3.bf16.msra.mxu0 %v1200_v6  ;;  %v281_v51 = vadd.s32 32, %v277_v41  ;;  %v282_v53 = vadd.s32 40, %v277_v41  ;;  %v283_v56 = vadd.s32 48, %v277_v41  ;;  %v284_v62 = vadd.s32 56, %v277_v41  ;;  %s1402_s24 = smov [#allocation2]  }
   0xa   :  { %v288_v44 = vxor.u32 %v286_v43, %v278_v42  ;;  %v295_v49 = vand.u32 49, %v287_v45  ;;  %v289_v50 = vxor.u32 %v286_v43, %v279_v46  ;;  %v290_v52 = vxor.u32 %v286_v43, %v280_v47  ;;  %s977_s25 = sshll.u32 %s1402_s24, 4  ;;  %s978_s25 = int_to_ptr.vmem [resolvable:$true] %s977_s25 }
   0xb   :  { %v291_v55 = vxor.u32 %v286_v43, %v281_v51  ;;  %v292_v61 = vxor.u32 %v286_v43, %v282_v53  ;;  %v293_v3 = vxor.u32 %v286_v43, %v283_v56  ;;  %p1375_p1 = scmp.lt.s32.totalorder %s978_s25, %s978_s25 }
   0xc   :  { %1097 = vmatmul.mubr.msk.f32.vlgmr.msra.gmra.mrb[0].mxu0 %vm26_vm0, %v1446_v7  ;;  %v296_v48 = vand.u32 49, %v288_v44  ;;  %vm303_vm4 = vcmp.eq.s32.totalorder %v295_v49, 0  ;;  %v297_v54 = vand.u32 49, %v289_v50  ;;  %v298_v60 = vand.u32 49, %v290_v52 }
   0xd   :  { %v299_v2 = vand.u32 49, %v291_v55 }
   0xe   :  { %vm304_vm3 = vcmp.eq.s32.totalorder %v296_v48, 0  ;;  %vm305_vm6 = vcmp.eq.s32.totalorder %v297_v54, 0  ;;  %vm306_vm7 = vcmp.eq.s32.totalorder %v298_v60, 0 }
   0xf   :  { %vm307_vm8 = vcmp.eq.s32.totalorder %v299_v2, 0 }
  0xdf   :  { %v1098_v9 = vpop.f32.mrb[0].mxu0 }
  0xe0   :  { %v99_v10 = vpop.f32.mrb[1].mxu0  ;;  %v105_v12 = vadd.f32 %v1098_v9, %v988_v8  ;;  %v294_v9 = vxor.u32 %v286_v43, %v284_v62 }
  0xe1   :  { %v100_v11 = vadd.f32 %v988_v8, %v99_v10  ;;  %v300_v8 = vand.u32 49, %v292_v61 }
  0xe3   :  { %114 = vrot.lane.b32.xlu1 %v100_v11, %s1394_s26  ;;  %110 = vrot.lane.b32.xlu0 %v100_v11, %s1395_s27  ;;  %v1454_v13 = vpack.i.bf16 %v105_v12, %v100_v11  ;;  %vm308_vm9 = vcmp.eq.s32.totalorder %v300_v8, 0 }
  0xe4   :  { %1115 = vmatprep.mubr.msk.f32.mxu1 %vm138_vm1, %v100_v11 }
  0xe7   :  { %116 = vrot.lane.b32.xlu1 %v105_v12, %s1394_s26  ;;  %112 = vrot.lane.b32.xlu0 %v105_v12, %s1395_s27  ;;  %s1370_s26 = scalar_lea.vmem %s978_s25, 256 }
  0xe8   :  { %p1371_p0 = scmp.ne.s32.totalorder %s978_s25, %s1370_s26  ;;  %p1376_p2 = scmp.lt.s32.totalorder %s1370_s26, %s1370_s26 }
  0xea   :  { %p1377_p3 = por %p1376_p2, %p1375_p1 }
  0xeb   :  { %120 = vrot.lane.b32.xlu1 %v105_v12, %s1396_s0  ;;  %118 = vrot.lane.b32.xlu0 %v100_v11, %s1396_s0 }
  0xec   :  { %p1378_p4 = pnand %p1377_p3, %p1371_p0 }
  0xef   :  { %1287 = vrot.lane.b32.xlu0 %v1454_v13, %s1397_s28 }
 0x155   :  { %v115_v14 = vpop.permute.xlu1 %114  ;;  %v111_v15 = vpop.permute.xlu0 %110 }
 0x159   :  { %v117_v16 = vpop.permute.xlu1 %116  ;;  %v113_v17 = vpop.permute.xlu0 %112 }
 0x15a   :  { %v1457_v18 = vpack.i.bf16 %v117_v16, %v115_v14  ;;  %v1459_v19 = vpack.i.bf16 %v113_v17, %v111_v15 }
 0x15c   :  { %1297 = vrot.lane.b32.xlu0 %v1457_v18, %s1397_s28  ;;  %1292 = vrot.lane.b32.xlu1 %v1459_v19, %s1397_s28 }
 0x15d   :  { %v121_v20 = vpop.permute.xlu1 %120  ;;  %v119_v21 = vpop.permute.xlu0 %118 }
 0x15e   :  { %v1463_v22 = vpack.i.bf16 %v121_v20, %v119_v21 }
 0x160   :  { %1302 = vrot.lane.b32.xlu1 %v1463_v22, %s1397_s28 }
 0x161   :  { %v1288_v23 = vpop.permute.xlu0 %1287 }
 0x162   :  { %v1290_v24 = vunpack.i.h.bf16 %v1288_v23  ;;  %v1289_v25 = vunpack.i.l.bf16 %v1288_v23 }
 0x164   :  { %v1204_v27 = vpack.c.bf16 %v1290_v24, %v1289_v25 }
 0x166   :  { %1206 = vmatprep.subr.msk.bf16.mxu1 %vm1468_vm2, %v1204_v27 }
 0x167   :  { %1209 = vmatpush3.bf16.xpose.msk.msra.mxu1 %vm1468_vm2, %v1204_v27 }
 0x1ce   :  { %v1293_v28 = vpop.permute.xlu1 %1292  ;;  %v1298_v29 = vpop.permute.xlu0 %1297 }
 0x1cf   :  { %v1295_v30 = vunpack.i.h.bf16 %v1293_v28  ;;  %v1294_v31 = vunpack.i.l.bf16 %v1293_v28  ;;  %v1300_v32 = vunpack.i.h.bf16 %v1298_v29  ;;  %v1299_v33 = vunpack.i.l.bf16 %v1298_v29 }
 0x1d1   :  { %v1210_v34 = vpack.c.bf16 %v1295_v30, %v1294_v31  ;;  %v1216_v35 = vpack.c.bf16 %v1300_v32, %v1299_v33 }
 0x1d2   :  { %v1303_v36 = vpop.permute.xlu1 %1302 }
 0x1d3   :  { %1212 = vmatprep.subr.msk.bf16.mxu1 %vm1468_vm2, %v1210_v34  ;;  %v1305_v37 = vunpack.i.h.bf16 %v1303_v36  ;;  %v1304_v38 = vunpack.i.l.bf16 %v1303_v36 }
 0x1d4   :  { %1215 = vmatpush3.bf16.xpose.msk.msra.mxu1 %vm1468_vm2, %v1210_v34 }
 0x1d5   :  { %1218 = vmatprep.subr.msk.bf16.mxu1 %vm1468_vm2, %v1216_v35  ;;  %v1222_v39 = vpack.c.bf16 %v1305_v37, %v1304_v38 }
 0x1dc   :  { %1221 = vmatpush3.bf16.xpose.msk.msra.mxu1 %vm1468_vm2, %v1216_v35 }
 0x1dd   :  { %1224 = vmatprep.subr.msk.bf16.mxu1 %vm1468_vm2, %v1222_v39 }
 0x1e4   :  { %1227 = vmatpush3.bf16.xpose.msk.msra.mxu1 %vm1468_vm2, %v1222_v39 }
 0x1eb   :  { %1116 = vmatmul.mubr.msk.f32.vlgmr.msra.gmra.mrb[0].mxu1 %vm138_vm1, %v105_v12  ;;  %v301_v12 = vand.u32 49, %v293_v3 }
 0x1ec   :  { %1118 = vmatprep.mubr.msk.f32.mxu1 %vm138_vm1, %v111_v15 }
 0x1ed   :  { %vm309_vm10 = vcmp.eq.s32.totalorder %v301_v12, 0 }
 0x1ef   :  { %1119 = vmatmul.mubr.msk.f32.gmra.mrb[2].mxu1 %vm138_vm1, %v113_v17  ;;  %v302_v17 = vand.u32 49, %v294_v9 }
 0x1f0   :  { %1121 = vmatprep.mubr.msk.f32.mxu1 %vm138_vm1, %v115_v14 }
 0x1f1   :  { %vm310_vm11 = vcmp.eq.s32.totalorder %v302_v17, 0 }
 0x1f3   :  { %1122 = vmatmul.mubr.msk.f32.gmra.mrb[4].mxu1 %vm138_vm1, %v117_v16 }
 0x1f4   :  { %1124 = vmatprep.mubr.msk.f32.mxu1 %vm138_vm1, %v119_v21 }
 0x1f7   :  { %1125 = vmatmul.mubr.msk.f32.gmra.mrb[6].mxu1 %vm138_vm1, %v121_v20 }
 0x2be   :  { %v1117_v57 = vpop.f32.mrb[0].mxu1 }
 0x2bf   :  { %v312_v58 = vsel %vm304_vm3, %v1117_v57, -1e+30  ;;  %v237_v59 = vpop.f32.mrb[1].mxu1 }
 0x2c0   :  { %v311_v63 = vsel %vm303_vm4, %v237_v59, -1e+30  ;;  %v323_v0 = vsel %vm319_vm5, %v312_v58, -inf }
 0x2c1   :  { %324 = vmax.xlane.f32.xlu1 %v323_v0  ;;  %v320_v1 = vsel %vm319_vm5, %v311_v63, -inf }
 0x2c2   :  { %321 = vmax.xlane.f32.xlu0 %v320_v1  ;;  %v1120_v4 = vpop.f32.mrb[2].mxu1 }
 0x2c3   :  { %v247_v6 = vpop.f32.mrb[3].mxu1  ;;  %v314_v14 = vsel %vm306_vm7, %v1120_v4, -1e+30 }
 0x2c4   :  { %v313_v10 = vsel %vm305_vm6, %v247_v6, -1e+30  ;;  %v329_v21 = vsel %vm319_vm5, %v314_v14, -inf }
 0x2c5   :  { %v326_v11 = vsel %vm319_vm5, %v313_v10, -inf }
 0x2c6   :  { %327 = vmax.xlane.f32.xlu0 %v326_v11  ;;  %v1123_v15 = vpop.f32.mrb[4].mxu1 }
 0x2c7   :  { %v257_v16 = vpop.f32.mrb[5].mxu1  ;;  %v316_v24 = vsel %vm308_vm9, %v1123_v15, -1e+30 }
 0x2c8   :  { %v315_v20 = vsel %vm307_vm8, %v257_v16, -1e+30  ;;  %v335_v28 = vsel %vm319_vm5, %v316_v24, -inf }
 0x2c9   :  { %v332_v23 = vsel %vm319_vm5, %v315_v20, -inf }
 0x2ca   :  { %330 = vmax.xlane.f32.xlu0 %v329_v21  ;;  %333 = vmax.xlane.f32.xlu1 %v332_v23  ;;  %v1126_v25 = vpop.f32.mrb[6].mxu1 }
 0x2cb   :  { %v267_v26 = vpop.f32.mrb[7].mxu1  ;;  %v318_v30 = vsel %vm310_vm11, %v1126_v25, -1e+30 }
 0x2cc   :  { %v317_v27 = vsel %vm309_vm10, %v267_v26, -1e+30  ;;  %v341_v31 = vsel %vm319_vm5, %v318_v30, -inf }
 0x2cd   :  { %v338_v29 = vsel %vm319_vm5, %v317_v27, -inf }
 0x2ce   :  { %336 = vmax.xlane.f32.xlu0 %v335_v28  ;;  %339 = vmax.xlane.f32.xlu1 %v338_v29 }
 0x2d2   :  { %342 = vmax.xlane.f32.xlu0 %v341_v31 }
 0x2df   :  { %1307 = vrot.lane.b32.xlu1 %v1454_v13, %s1398_s29 }
 0x34e   :  { %v325_v32 = vpop.xlane.xlu1 %324 }
 0x34f   :  { %v345_v33 = vsub.f32 %v312_v58, %v325_v32  ;;  %v322_v34 = vpop.xlane.xlu0 %321 }
 0x350   :  { %v344_v35 = vsub.f32 %v311_v63, %v322_v34 }
 0x351   :  { %v354_v36 = vmul.f32 1.442695, %v345_v33 }
 0x352   :  { %v352_v37 = vmul.f32 1.442695, %v344_v35 }
 0x353   :  { %1326 = vpow2.f32 %v354_v36  ;;  %v328_v38 = vpop.xlane.xlu0 %327 }
 0x354   :  { %1328 = vpow2.f32 %v352_v37  ;;  %v346_v39 = vsub.f32 %v313_v10, %v328_v38 }
 0x356   :  { %v356_v40 = vmul.f32 1.442695, %v346_v39 }
 0x357   :  { %v331_v41 = vpop.xlane.xlu0 %330  ;;  %v334_v42 = vpop.xlane.xlu1 %333 }
 0x358   :  { %1330 = vpow2.f32 %v356_v40  ;;  %v347_v43 = vsub.f32 %v314_v14, %v331_v41  ;;  %v348_v44 = vsub.f32 %v315_v20, %v334_v42 }
 0x35a   :  { %v358_v45 = vmul.f32 1.442695, %v347_v43  ;;  %v360_v46 = vmul.f32 1.442695, %v348_v44 }
 0x35b   :  { %v337_v47 = vpop.xlane.xlu0 %336  ;;  %v340_v13 = vpop.xlane.xlu1 %339 }
 0x35c   :  { %1332 = vpow2.f32 %v358_v45  ;;  %v349_v48 = vsub.f32 %v316_v24, %v337_v47  ;;  %v350_v52 = vsub.f32 %v317_v27, %v340_v13 }
 0x35d   :  { %v1505_v49 = vpop.eup %1326  ;;  %1334 = vpow2.f32 %v360_v46 }
 0x35e   :  { %v1329_v50 = vpop.eup %1328  ;;  %v362_v51 = vmul.f32 1.442695, %v349_v48  ;;  %v371_v53 = vsel %vm319_vm5, %v1505_v49, 0.0  ;;  %v364_v61 = vmul.f32 1.442695, %v350_v52  ;;  %v595_v52 = vld [vmem:[%s1656_s1 + $0x30] sm:$0xff] }
 0x35f   :  { %372 = vadd.xlane.f32.xlu0 %v371_v53  ;;  %v343_v54 = vpop.xlane.xlu0 %342  ;;  %v1308_v55 = vpop.permute.xlu1 %1307  ;;  %v368_v56 = vsel %vm319_vm5, %v1329_v50, 0.0  ;;  %v596_v53 = vld [vmem:[%s1656_s1 + $0x38] sm:$0xff] }
 0x360   :  { %1336 = vpow2.f32 %v362_v51  ;;  %v351_v57 = vsub.f32 %v318_v30, %v343_v54  ;;  %v1310_v58 = vunpack.i.h.bf16 %v1308_v55  ;;  %v1309_v59 = vunpack.i.l.bf16 %v1308_v55  ;;  %369 = vadd.xlane.f32.xlu1 %v368_v56 }
 0x361   :  { %v1248_v54 = vpack.c.bf16 %v596_v53, %v595_v52  ;;  %v834_v52 = vld [vmem:[%s1656_s1 + $0x60] sm:$0xff]  ;;  %v835_v53 = vld [vmem:[%s1656_s1 + $0x68] sm:$0xff] }
 0x362   :  { %v1510_v60 = vpop.eup %1330  ;;  %v366_v62 = vmul.f32 1.442695, %v351_v57  ;;  %v1228_v63 = vpack.c.bf16 %v1310_v58, %v1309_v59 }
 0x363   :  { %v374_v0 = vsel %vm319_vm5, %v1510_v60, 0.0 }
 0x364   :  { %1338 = vpow2.f32 %v366_v62  ;;  %375 = vadd.xlane.f32.xlu1 %v374_v0  ;;  %1229 = vmatprep.subr.bf16.mxu0 %v1228_v63 }
 0x365   :  { %1231 = vmatpush3.bf16.msra.mxu0 %v1228_v63  ;;  %1340 = vpow2.f32 %v364_v61 }
 0x366   :  { %v1514_v1 = vpop.eup %1332 }
 0x367   :  { %v1516_v2 = vpop.eup %1334  ;;  %v377_v3 = vsel %vm319_vm5, %v1514_v1, 0.0 }
 0x368   :  { %378 = vadd.xlane.f32.xlu0 %v377_v3  ;;  %v380_v4 = vsel %vm319_vm5, %v1516_v2, 0.0 }
 0x369   :  { %381 = vadd.xlane.f32.xlu1 %v380_v4 }
 0x36a   :  { %v1522_v6 = vpop.eup %1336 }
 0x36b   :  { %v383_v8 = vsel %vm319_vm5, %v1522_v6, 0.0 }
 0x36c   :  { %384 = vadd.xlane.f32.xlu0 %v383_v8 }
 0x36e   :  { %v1526_v9 = vpop.eup %1338 }
 0x36f   :  { %v389_v10 = vsel %vm319_vm5, %v1526_v9, 0.0  ;;  %v1341_v11 = vpop.eup %1340 }
 0x370   :  { %390 = vadd.xlane.f32.xlu0 %v389_v10  ;;  %v386_v12 = vsel %vm319_vm5, %v1341_v11, 0.0 }
 0x374   :  { %387 = vadd.xlane.f32.xlu0 %v386_v12 }
 0x37a   :  { %1317 = vrot.lane.b32.xlu1 %v1457_v18, %s1398_s29 }
 0x37e   :  { %1322 = vrot.lane.b32.xlu1 %v1463_v22, %s1398_s29 }
 0x38a   :  { %1312 = vrot.lane.b32.xlu0 %v1459_v19, %s1398_s29 }
 0x3ec   :  { %v373_v15 = vpop.xlane.xlu0 %372 }
 0x3ed   :  { %v370_v14 = vpop.xlane.xlu1 %369 }
 0x3ee   :  { %1342 = vrcp.f32 %v370_v14  ;;  %v1015_v14 = vld [vmem:[%s1657_s2 + $0x1] ss:$0 sm:$0xff] }
 0x3ef   :  { %1344 = vrcp.f32 %v373_v15 }
 0x3f1   :  { %v376_v16 = vpop.xlane.xlu1 %375 }
 0x3f2   :  { %1346 = vrcp.f32 %v376_v16 }
 0x3f5   :  { %v379_v17 = vpop.xlane.xlu0 %378 }
 0x3f6   :  { %v382_v24 = vpop.xlane.xlu1 %381  ;;  %1348 = vrcp.f32 %v379_v17 }
 0x3f7   :  { %1350 = vrcp.f32 %v382_v24 }
 0x3f8   :  { %v1343_v20 = vpop.eup %1342 }
 0x3f9   :  { %v385_v21 = vpop.xlane.xlu0 %384  ;;  %v393_v23 = vmul.f32 %v1343_v20, %v1329_v50  ;;  %v1345_v36 = vpop.eup %1344  ;;  %v594_v50 = vld [vmem:[%s1656_s1 + $0x28] sm:$0xff] }
 0x3fa   :  { %v1318_v26 = vpop.permute.xlu1 %1317  ;;  %1352 = vrcp.f32 %v385_v21  ;;  %v395_v38 = vmul.f32 %v1345_v36, %v1505_v49  ;;  %v593_v49 = vld [vmem:[%s1656_s1 + $0x20] sm:$0xff] }
 0x3fb   :  { %1143 = vmatprep.mubr.msk.f32.mxu0 %vm319_vm5, %v393_v23  ;;  %v1320_v28 = vunpack.i.h.bf16 %v1318_v26  ;;  %v1319_v22 = vunpack.i.l.bf16 %v1318_v26  ;;  %v1244_v51 = vpack.c.bf16 %v594_v50, %v593_v49 }
 0x3fc   :  { %v1347_v37 = vpop.eup %1346 }
 0x3fd   :  { %v391_v25 = vpop.xlane.xlu0 %390  ;;  %v1236_v32 = vpack.c.bf16 %v1320_v28, %v1319_v22  ;;  %v397_v40 = vmul.f32 %v1347_v37, %v1510_v60 }
 0x3fe   :  { %v1323_v19 = vpop.permute.xlu1 %1322 }
 0x3ff   :  { %v1325_v33 = vunpack.i.h.bf16 %v1323_v19  ;;  %v1324_v34 = vunpack.i.l.bf16 %v1323_v19 }
 0x400   :  { %v1349_v39 = vpop.eup %1348 }
 0x401   :  { %v388_v18 = vpop.xlane.xlu0 %387  ;;  %v1240_v35 = vpack.c.bf16 %v1325_v33, %v1324_v34  ;;  %v1351_v41 = vpop.eup %1350  ;;  %v399_v42 = vmul.f32 %v1349_v39, %v1514_v1  ;;  %v728_v34 = vld [vmem:[%s1656_s1 + $0x50] sm:$0xff] }
 0x402   :  { %1354 = vrcp.f32 %v388_v18  ;;  %v401_v44 = vmul.f32 %v1351_v41, %v1516_v2 }
 0x403   :  { %1356 = vrcp.f32 %v391_v25 }
 0x404   :  { %v1353_v43 = vpop.eup %1352 }
 0x405   :  { %v1313_v27 = vpop.permute.xlu0 %1312  ;;  %v403_v46 = vmul.f32 %v1353_v43, %v1522_v6 }
 0x406   :  { %v1315_v29 = vunpack.i.h.bf16 %v1313_v27  ;;  %v1314_v30 = vunpack.i.l.bf16 %v1313_v27 }
 0x408   :  { %v1232_v31 = vpack.c.bf16 %v1315_v29, %v1314_v30 }
 0x40a   :  { %1233 = vmatprep.subr.bf16.mxu0 %v1232_v31 }
 0x40b   :  { %1235 = vmatpush3.bf16.msra.mxu0 %v1232_v31 }
 0x40c   :  { %1237 = vmatprep.subr.bf16.mxu0 %v1236_v32  ;;  %v1355_v45 = vpop.eup %1354 }
 0x40d   :  { %v1357_v47 = vpop.eup %1356  ;;  %v405_v13 = vmul.f32 %v1355_v45, %v1341_v11 }
 0x40e   :  { %v407_v48 = vmul.f32 %v1357_v47, %v1526_v9 }
 0x40f   :  { %1239 = vmatpush3.bf16.msra.mxu0 %v1236_v32  ;;  %v727_v32 = vld [vmem:[%s1656_s1 + $0x48] sm:$0xff] }
 0x410   :  { %1241 = vmatprep.subr.bf16.mxu0 %v1240_v35 }
 0x413   :  { %1243 = vmatpush3.bf16.msra.mxu0 %v1240_v35  ;;  %v729_v35 = vld [vmem:[%s1656_s1 + $0x58] sm:$0xff] }
 0x414   :  { %1245 = vmatprep.subr.bf16.mxu0 %v1244_v51  ;;  %v1256_v36 = vpack.c.bf16 %v729_v35, %v728_v34 }
 0x416   :  { %1144 = vmatmul.mubr.msk.f32.vlgmr.msra.gmra.mrb[2].mxu0 %vm319_vm5, %v395_v38 }
 0x417   :  { %1146 = vmatprep.mubr.msk.f32.mxu0 %vm319_vm5, %v397_v40  ;;  %1247 = vmatpush3.bf16.msra.mxu0 %v1244_v51 }
 0x418   :  { %1249 = vmatprep.subr.bf16.mxu0 %v1248_v54 }
 0x41a   :  { %1147 = vmatmul.mubr.msk.f32.gmra.mrb[4].mxu0 %vm319_vm5, %v399_v42 }
 0x41b   :  { %1149 = vmatprep.mubr.msk.f32.mxu0 %vm319_vm5, %v401_v44  ;;  %1251 = vmatpush3.bf16.msra.mxu0 %v1248_v54  ;;  %v1018_v44 = vld [vmem:[%s1657_s2 + $0x4] ss:$0 sm:$0xff]  ;;  %v1260_v54 = vpack.c.bf16 %v835_v53, %v834_v52  ;;  %v1027_v53 = vld [vmem:[%s1657_s2 + $0x7] ss:$0 sm:$0xff] }
 0x41d   :  { %1261 = vmatprep.subr.bf16.mxu1 %v1260_v54 }
 0x41e   :  { %1150 = vmatmul.mubr.msk.f32.gmra.mrb[6].mxu0 %vm319_vm5, %v403_v46  ;;  %v1019_v46 = vld [vmem:[%s1657_s2 + $0x5] ss:$0 sm:$0xff]  ;;  %1263 = vmatpush3.bf16.msra.mxu1 %v1260_v54 }
 0x41f   :  { %1152 = vmatprep.mubr.msk.f32.mxu0 %vm319_vm5, %v405_v13 }
 0x422   :  { %1153 = vmatmul.mubr.msk.f32.gmra.mrb[8].mxu0 %vm319_vm5, %v407_v48 }
 0x4e9   :  { %v1145_v55 = vpop.f32.mrb[2].mxu0 }
 0x4ea   :  { %v522_v56 = vpop.f32.mrb[3].mxu0 }
 0x4ed   :  { %v1148_v57 = vpop.f32.mrb[4].mxu0 }
 0x4ee   :  { %565 = vrot.lane.b32.xlu1 %v1148_v57, %s1399_s11  ;;  %v532_v58 = vpop.f32.mrb[5].mxu0 }
 0x4f1   :  { %v1151_v59 = vpop.f32.mrb[6].mxu0 }
 0x4f2   :  { %563 = vrot.lane.b32.xlu1 %v532_v58, %s1399_s11  ;;  %v542_v60 = vpop.f32.mrb[7].mxu0  ;;  %v838_v58 = vld [vmem:[%s1656_s1 + $0x80] sm:$0xff] }
 0x4f3   :  { %571 = vrot.lane.b32.xlu0 %v542_v60, %s1400_s12 }
 0x4f5   :  { %v1154_v61 = vpop.f32.mrb[8].mxu0 }
 0x4f6   :  { %573 = vrot.lane.b32.xlu1 %v1151_v59, %s1400_s12  ;;  %v552_v62 = vpop.f32.mrb[9].mxu0  ;;  %v839_v59 = vld [vmem:[%s1656_s1 + $0x88] sm:$0xff] }
 0x4f7   :  { %579 = vrot.lane.b32.xlu0 %v552_v62, %s1401_s13  ;;  %v1268_v60 = vpack.c.bf16 %v839_v59, %v838_v58  ;;  %v841_v62 = vld [vmem:[%s1656_s1 + $0x98] sm:$0xff] }
 0x4fa   :  { %581 = vrot.lane.b32.xlu1 %v1154_v61, %s1401_s13  ;;  %v840_v61 = vld [vmem:[%s1656_s1 + $0x90] sm:$0xff] }
 0x560   :  { %v566_v63 = vpop.permute.xlu1 %565 }
 0x561   :  { %v586_v9 = vsel %vm138_vm1, %v1145_v55, %v566_v63  ;;  %v836_v55 = vld [vmem:[%s1656_s1 + $0x70] sm:$0xff]  ;;  %v1272_v63 = vpack.c.bf16 %v841_v62, %v840_v61 }
 0x564   :  { %v564_v0 = vpop.permute.xlu1 %563 }
 0x565   :  { %v572_v1 = vpop.permute.xlu0 %571  ;;  %v585_v2 = vsel %vm138_vm1, %v522_v56, %v564_v0  ;;  %v837_v56 = vld [vmem:[%s1656_s1 + $0x78] sm:$0xff]  ;;  %v1020_v0 = vld [vmem:[%s1657_s2 + $0x2] ss:$0 sm:$0xff] }
 0x566   :  { %v588_v4 = vsel %vm587_vm12, %v585_v2, %v572_v1  ;;  %v1264_v57 = vpack.c.bf16 %v837_v56, %v836_v55 }
 0x568   :  { %v574_v3 = vpop.permute.xlu1 %573  ;;  %1265 = vmatprep.subr.bf16.mxu1 %v1264_v57 }
 0x569   :  { %v580_v6 = vpop.permute.xlu0 %579  ;;  %v589_v10 = vsel %vm587_vm12, %v586_v9, %v574_v3  ;;  %1267 = vmatpush3.bf16.msra.mxu1 %v1264_v57 }
 0x56a   :  { %v591_v8 = vsel %vm590_vm13, %v588_v4, %v580_v6  ;;  %1269 = vmatprep.subr.bf16.mxu1 %v1268_v60 }
 0x56b   :  { %1163 = vmatprep.mubr.msk.f32.mxu0 %vm26_vm0, %v591_v8 }
 0x56c   :  { %v582_v11 = vpop.permute.xlu1 %581 }
 0x56d   :  { %v592_v12 = vsel %vm590_vm13, %v589_v10, %v582_v11  ;;  %1271 = vmatpush3.bf16.msra.mxu1 %v1268_v60 }
 0x56e   :  { %1164 = vmatmul.mubr.msk.f32.vlgmr.msra.gmra.mrb[10].mxu0 %vm26_vm0, %v592_v12  ;;  %1273 = vmatprep.subr.bf16.mxu1 %v1272_v63 }
 0x571   :  { %1275 = vmatpush3.bf16.msra.mxu1 %v1272_v63 }
 0x641   :  { %v1165_v15 = vpop.f32.mrb[10].mxu0 }
 0x642   :  { %v680_v16 = vadd.f32 %v1165_v15, %v1015_v14  ;;  %v674_v17 = vpop.f32.mrb[11].mxu0 }
 0x643   :  { %v675_v20 = vadd.f32 %v1015_v14, %v674_v17 }
 0x644   :  { %v684_v21 = vadd.f32 %v680_v16, %v1446_v7 }
 0x645   :  { %v683_v23 = vadd.f32 %v675_v20, %v1439_v5  ;;  %v726_v5 = vld [vmem:[%s1656_s1 + $0x40] sm:$0xff] }
 0x646   :  { %v690_v24 = vsel %vm26_vm0, %v684_v21, 0.0  ;;  %v1252_v33 = vpack.c.bf16 %v727_v32, %v726_v5 }
 0x647   :  { %691 = vadd.xlane.f32.xlu1 %v690_v24  ;;  %v687_v25 = vsel %vm26_vm0, %v683_v23, 0.0 }
 0x648   :  { %688 = vadd.xlane.f32.xlu0 %v687_v25  ;;  %1253 = vmatprep.subr.bf16.mxu0 %v1252_v33 }
 0x649   :  { %1255 = vmatpush3.bf16.msra.mxu0 %v1252_v33 }
 0x64a   :  { %1257 = vmatprep.subr.bf16.mxu0 %v1256_v36 }
 0x64d   :  { %1259 = vmatpush3.bf16.msra.mxu0 %v1256_v36 }
 0x6d4   :  { %v692_v26 = vpop.xlane.xlu1 %691 }
 0x6d5   :  { %v695_v18 = vmul.f32 0.03125, %v692_v26  ;;  %v689_v27 = vpop.xlane.xlu0 %688 }
 0x6d6   :  { %v694_v28 = vmul.f32 0.03125, %v689_v27 }
 0x6d7   :  { %v697_v22 = vsub.f32 %v684_v21, %v695_v18 }
 0x6d8   :  { %v696_v29 = vsub.f32 %v683_v23, %v694_v28  ;;  %v1023_v28 = vld [vmem:[%s1657_s2 + $0x3] ss:$0 sm:$0xff] }
 0x6d9   :  { %v699_v31 = vmul.f32 %v697_v22, %v697_v22 }
 0x6da   :  { %v698_v30 = vmul.f32 %v696_v29, %v696_v29 }
 0x6db   :  { %v703_v7 = vsel %vm26_vm0, %v699_v31, 0.0 }
 0x6dc   :  { %v700_v19 = vsel %vm26_vm0, %v698_v30, 0.0 }
 0x6dd   :  { %701 = vadd.xlane.f32.xlu0 %v700_v19 }
 0x6e1   :  { %704 = vadd.xlane.f32.xlu0 %v703_v7 }
 0x76a   :  { %v702_v37 = vpop.xlane.xlu0 %701 }
 0x76b   :  { %v706_v38 = vmul.f32 0.03125, %v702_v37 }
 0x76d   :  { %v708_v39 = vadd.f32 1e-05, %v706_v38 }
 0x76e   :  { %v705_v40 = vpop.xlane.xlu0 %704 }
 0x76f   :  { %1358 = vrsqrt.f32 %v708_v39  ;;  %v707_v41 = vmul.f32 0.03125, %v705_v40 }
 0x771   :  { %v709_v42 = vadd.f32 1e-05, %v707_v41 }
 0x773   :  { %1360 = vrsqrt.f32 %v709_v42 }
 0x779   :  { %v1359_v43 = vpop.eup %1358 }
 0x77a   :  { %v712_v45 = vmul.f32 %v1359_v43, %v696_v29 }
 0x77c   :  { %v718_v47 = vmul.f32 %v1018_v44, %v712_v45 }
 0x77d   :  { %v1361_v13 = vpop.eup %1360 }
 0x77e   :  { %v713_v48 = vmul.f32 %v1361_v13, %v697_v22  ;;  %v724_v49 = vadd.f32 %v1019_v46, %v718_v47 }
 0x780   :  { %v719_v50 = vmul.f32 %v1018_v44, %v713_v48  ;;  %1174 = vmatprep.mubr.msk.f32.mxu0 %vm26_vm0, %v724_v49 }
 0x782   :  { %v725_v51 = vadd.f32 %v1019_v46, %v719_v50 }
 0x784   :  { %1175 = vmatmul.mubr.msk.f32.vlgmr.msra.gmra.mrb[12].mxu0 %vm26_vm0, %v725_v51 }
 0x857   :  { %v1176_v1 = vpop.f32.mrb[12].mxu0 }
 0x858   :  { %v813_v2 = vadd.f32 %v1176_v1, %v1020_v0  ;;  %v807_v3 = vpop.f32.mrb[13].mxu0 }
 0x859   :  { %v808_v4 = vadd.f32 %v1020_v0, %v807_v3 }
 0x85a   :  { %v819_v6 = vmul.f32 0.044715, %v813_v2  ;;  %v817_v26 = vmul.f32 0.5, %v813_v2 }
 0x85b   :  { %v818_v8 = vmul.f32 0.044715, %v808_v4  ;;  %v816_v24 = vmul.f32 0.5, %v808_v4 }
 0x85c   :  { %v821_v9 = vmul.f32 %v819_v6, %v813_v2 }
 0x85d   :  { %v820_v10 = vmul.f32 %v818_v8, %v808_v4 }
 0x85e   :  { %v823_v11 = vmul.f32 %v821_v9, %v813_v2 }
 0x85f   :  { %v822_v12 = vmul.f32 %v820_v10, %v808_v4 }
 0x860   :  { %v825_v14 = vadd.f32 %v823_v11, %v813_v2 }
 0x861   :  { %v824_v15 = vadd.f32 %v822_v12, %v808_v4 }
 0x862   :  { %v827_v16 = vmul.f32 0.7978846, %v825_v14 }
 0x863   :  { %v826_v17 = vmul.f32 0.7978846, %v824_v15 }
 0x864   :  { %1362 = vtanh.f32 %v827_v16 }
 0x865   :  { %1364 = vtanh.f32 %v826_v17 }
 0x86e   :  { %v1363_v20 = vpop.eup %1362 }
 0x86f   :  { %v1365_v21 = vpop.eup %1364  ;;  %v831_v23 = vadd.f32 1.0, %v1363_v20 }
 0x870   :  { %v830_v25 = vadd.f32 1.0, %v1365_v21 }
 0x871   :  { %v833_v27 = vmul.f32 %v831_v23, %v817_v26 }
 0x872   :  { %v832_v18 = vmul.f32 %v830_v25, %v816_v24 }
 0x874   :  { %1193 = vmatprep.mubr.msk.f32.mxu1 %vm319_vm5, %v832_v18 }
 0x875   :  { %1194 = vmatmul.mubr.msk.f32.vlgmr.msra.gmra.mrb[8].mxu1 %vm319_vm5, %v833_v27 }
 0x948   :  { %v1195_v22 = vpop.f32.mrb[8].mxu1 }
 0x949   :  { %v925_v29 = vadd.f32 %v1195_v22, %v1023_v28  ;;  %v919_v30 = vpop.f32.mrb[9].mxu1 }
 0x94a   :  { %v920_v19 = vadd.f32 %v1023_v28, %v919_v30 }
 0x94b   :  { %v929_v31 = vadd.f32 %v925_v29, %v725_v51 }
 0x94c   :  { %v928_v7 = vadd.f32 %v920_v19, %v724_v49  ;;  %v1026_v49 = vld [vmem:[%s1657_s2 + $0x6] ss:$0 sm:$0xff] }
 0x94d   :  { %v935_v5 = vsel %vm26_vm0, %v929_v31, 0.0 }
 0x94e   :  { %936 = vadd.xlane.f32.xlu0 %v935_v5  ;;  %v932_v32 = vsel %vm26_vm0, %v928_v7, 0.0 }
 0x94f   :  { %933 = vadd.xlane.f32.xlu1 %v932_v32 }
 0x9db   :  { %v937_v33 = vpop.xlane.xlu0 %936 }
 0x9dc   :  { %v939_v34 = vmul.f32 0.03125, %v937_v33  ;;  %v934_v35 = vpop.xlane.xlu1 %933 }
 0x9dd   :  { %v938_v36 = vmul.f32 0.03125, %v934_v35 }
 0x9de   :  { %v941_v37 = vsub.f32 %v929_v31, %v939_v34 }
 0x9df   :  { %v940_v38 = vsub.f32 %v928_v7, %v938_v36 }
 0x9e0   :  { %v943_v39 = vmul.f32 %v941_v37, %v941_v37 }
 0x9e1   :  { %v942_v40 = vmul.f32 %v940_v38, %v940_v38 }
 0x9e2   :  { %v947_v41 = vsel %vm26_vm0, %v943_v39, 0.0 }
 0x9e3   :  { %948 = vadd.xlane.f32.xlu0 %v947_v41  ;;  %v944_v42 = vsel %vm26_vm0, %v942_v40, 0.0 }
 0x9e4   :  { %945 = vadd.xlane.f32.xlu1 %v944_v42 }
 0xa70   :  { %v949_v43 = vpop.xlane.xlu0 %948 }
 0xa71   :  { %v951_v44 = vmul.f32 0.03125, %v949_v43  ;;  %v946_v45 = vpop.xlane.xlu1 %945 }
 0xa72   :  { %v950_v46 = vmul.f32 0.03125, %v946_v45 }
 0xa73   :  { %v953_v47 = vadd.f32 1e-05, %v951_v44 }
 0xa74   :  { %v952_v13 = vadd.f32 1e-05, %v950_v46 }
 0xa75   :  { %1366 = vrsqrt.f32 %v953_v47 }
 0xa76   :  { %1368 = vrsqrt.f32 %v952_v13 }
 0xa7f   :  { %v1367_v48 = vpop.eup %1366 }
 0xa80   :  { %v1369_v50 = vpop.eup %1368  ;;  %v957_v51 = vmul.f32 %v1367_v48, %v941_v37 }
 0xa81   :  { %v956_v52 = vmul.f32 %v1369_v50, %v940_v38 }
 0xa82   :  { %v963_v54 = vmul.f32 %v1026_v49, %v957_v51 }
 0xa83   :  { %v962_v55 = vmul.f32 %v1026_v49, %v956_v52 }
 0xa84   :  { %v969_v56 = vadd.f32 %v1027_v53, %v963_v54 }
 0xa85   :  { %v968_v57 = vadd.f32 %v1027_v53, %v962_v55 }
 0xa86   :  { %971 = vst.msk [vmem:[#allocation2 + $0x8] sm:$0xff] %vm26_vm0, %v969_v56 }
 0xa87   :  { %970 = vst.msk [vmem:[#allocation2] sm:$0xff] %vm26_vm0, %v968_v57 }
 0xa88   :  { %1381 = shalt.err (!%p1378_p4)
}
 0xa89   :  { %s1382_s0 = scalar_lea.hbm %s1658_s3, 256 }
 0xa8a   :  { %p1383_p5 = scmp.ne.s32.totalorder %s1658_s3, %s1382_s0  ;;  %p1386_p6 = scmp.lt.u32.totalorder %s1382_s0, %s1658_s3 }
 0xa8c   :  { %p1388_p7 = pnand %p1386_p6, %p1383_p5 }
 0xa8e   :  { %1391 = shalt.err (!%p1388_p7)
}
 0xa8f   :  { %s1403_s5 = smov 128  }
 0xa90   :  { %983 = dma.vmem_to_hbm [thread:$0]  %s978_s25, 256, %s1658_s3, [#allocation3], %s1403_s5, %s1403_s5, %s1399_s11  }
 0xa91   :  { %1392 = dma.done.wait [#allocation3], 256  }
 0xa92   :  { %1393 = vsyncadd [#allocation3], 4294967040 }
 0xa93   :  { %987 = vsyncpa [#allocation3], 1 }

</bundles_post_ra>
